<compile_context>
chip_gen: v7x
topology: tpu7x:2x2x1
jax: 0.10.0
libtpu: 0.0.40
codegen_flags: <defaults>
</compile_context>

<pallas_src>
import functools

import jax
import jax.numpy as jnp
from jax.experimental import pallas as pl
from jax.experimental.pallas import tpu as pltpu


def _round_up(x, m):
    return ((x + m - 1) // m) * m


def _pick_tile_m(n_pad, n_pad_k, a_elem_bytes=1, a_budget_bytes=12 << 20):
    """Pick the dst tile size t_m.

    Largest multiple-of-32 divisor of n_pad, capped at 1024 and at what keeps a
    double-buffered (t_m, n_pad_k) int8 A block within `a_budget_bytes`;
    prefer >= 2 dst tiles so both v7x TensorCores get work.
    """
    cap_fit = (a_budget_bytes // 2) // max(1, n_pad_k * a_elem_bytes)
    cap = max(32, min(n_pad, 1024, (cap_fit // 32) * 32))
    best = 32
    for t in range(32, cap + 1, 32):
        if n_pad % t == 0:
            best = t
    if n_pad // best < 2 and n_pad >= 256:
        best = n_pad // 2          # n_pad is a multiple of 128 -> still mult of 32
    return best


def _hgc_kernel(a_ref, y_ref, nd_ref, b_ref, o_ref, *, apply_relu):
    r = pl.program_id(1)

    # Output tile is resident across relations; init once with the
    # relation-summed bias (bias add hoisted out of the relation loop).
    @pl.when(r == 0)
    def _():
        o_ref[...] = jnp.broadcast_to(b_ref[...], o_ref.shape)

    # int8 (exact 0/1) adjacency -> bf16 for the MXU; single full-K matmul
    # per (dst tile, relation): A_r[m, :] @ Y_r  with Y_r = (X*norm_src_r)@W_r.
    a = a_ref[0].astype(jnp.float32).astype(jnp.bfloat16)
    contrib = jnp.dot(a, y_ref[r], preferred_element_type=jnp.float32)
    o_ref[...] += contrib * nd_ref[0]

    if apply_relu:  # fused F.relu after the last relation of layer 1
        @pl.when(r == pl.num_programs(1) - 1)
        def _():
            o_ref[...] = jnp.maximum(o_ref[...], 0.0)


def _hetero_conv(x, a_p, norm_src, nd_p, weights, biases, n, t_m, n_pad, *,
                 apply_relu):
    """One HeteroGraphConv({rel: GraphConv(in,out)}, aggregate='sum') layer."""
    R = a_p.shape[0]
    f_out = weights.shape[2]
    f_pad = _round_up(f_out, 128)          # lane-dense output / stores

    # Y_r = (X * norm_src_r) @ W_r == norm_src_r * (X @ W_r): row scaling
    # commutes with the right matmul -> no [R, N, F_in] intermediate.
    y = jnp.einsum('nf,rfg->rng', x, weights) * norm_src[:, :, None]  # [R,N,F_out] f32
    y_p = jnp.zeros((R, n_pad, f_pad), jnp.bfloat16
                    ).at[:, :n, :f_out].set(y.astype(jnp.bfloat16))
    b_p = jnp.zeros((1, f_pad), jnp.float32
                    ).at[0, :f_out].set(jnp.sum(biases, axis=0))

    grid = (n_pad // t_m, R)               # (dst tiles, relations)

    out_p = pl.pallas_call(
        functools.partial(_hgc_kernel, apply_relu=apply_relu),
        out_shape=jax.ShapeDtypeStruct((n_pad, f_pad), jnp.float32),
        grid_spec=pltpu.PrefetchScalarGridSpec(
            num_scalar_prefetch=0,
            grid=grid,
            in_specs=[
                # A_r: rectangular full-K block, int8 storage (dominant stream).
                pl.BlockSpec((1, t_m, n_pad), lambda m, r: (r, m, 0)),
                # Y: whole array, VMEM-resident (constant index -> one DMA).
                pl.BlockSpec((R, n_pad, f_pad), lambda m, r: (0, 0, 0)),
                # dst-side norm for this (r, m) tile (tiny).
                pl.BlockSpec((1, t_m, 1), lambda m, r: (r, m, 0)),
                # relation-summed bias, resident (constant index).
                pl.BlockSpec((1, f_pad), lambda m, r: (0, 0)),
            ],
            out_specs=pl.BlockSpec((t_m, f_pad), lambda m, r: (m, 0)),
        ),
        compiler_params=pltpu.CompilerParams(
            dimension_semantics=("parallel", "arbitrary"),
            vmem_limit_bytes=40 * 1024 * 1024,   # < v7x 64 MiB physical
        ),
    )(a_p, y_p, nd_p, b_p)

    # Padded rows hold bias garbage by construction; this slice removes them.
    return out_p[:n, :f_out]


def hetero_gcn_citeseer(x, adjs, w1, b1, w2, b2):
    """Forward pass of HeteroGCNCiteer: conv1 -> ReLU -> conv2 (sum agg).

    x: [N, F_in] f32; adjs: [R, N, N] f32 (0/1, dst x src);
    w1: [R, F_in, F_hid]; b1: [R, F_hid]; w2: [R, F_hid, F_out]; b2: [R, F_out].
    Returns [N, F_out] f32.
    """
    R, N, _ = adjs.shape
    n_pad = _round_up(N, 128)              # pad to hardware tile only, not to t
    t_m = _pick_tile_m(n_pad, n_pad)

    # int8 adjacency (0/1 exact): halves the dominant HBM stream vs bf16.
    a_p = jnp.zeros((R, n_pad, n_pad), jnp.int8
                    ).at[:, :N, :N].set(adjs.astype(jnp.int8))

    # Degrees from the int8 copy, f32 accumulation (exact for counts).
    deg_src = jnp.sum(a_p, axis=1, dtype=jnp.float32)            # out-deg of src [R, n_pad]
    deg_dst = jnp.sum(a_p, axis=2, dtype=jnp.float32)            # in-deg of dst  [R, n_pad]
    norm_src = jax.lax.rsqrt(jnp.maximum(deg_src[:, :N], 1.0))   # [R, N]
    nd_p = jax.lax.rsqrt(jnp.maximum(deg_dst, 1.0))[:, :, None]  # [R, n_pad, 1]

    h = _hetero_conv(x, a_p, norm_src, nd_p, w1, b1, N, t_m, n_pad,
                     apply_relu=True)
    return _hetero_conv(h, a_p, norm_src, nd_p, w2, b2, N, t_m, n_pad,
                        apply_relu=False)


# ----------------------------- pure-JAX reference -----------------------------
def _graphconv_ref(x, a, w, b):
    norm_src = jax.lax.rsqrt(jnp.maximum(jnp.sum(a, axis=0), 1.0))
    norm_dst = jax.lax.rsqrt(jnp.maximum(jnp.sum(a, axis=1, keepdims=True), 1.0))
    return ((a @ (x * norm_src[:, None])) @ w) * norm_dst + b


def hetero_gcn_reference(x, adjs, w1, b1, w2, b2):
    R = adjs.shape[0]
    h = sum(_graphconv_ref(x, adjs[r], w1[r], b1[r]) for r in range(R))
    h = jnp.maximum(h, 0.0)
    return sum(_graphconv_ref(h, adjs[r], w2[r], b2[r]) for r in range(R))


if __name__ == "__main__":
    # Small synthetic heterogeneous graph: 1 node type, R=3 edge types.
    # N > t_m so the multi-dst-tile path, relation accumulation and the fused
    # ReLU-at-last-relation path are all exercised (n_pad=256, t_m=128).
    N, F_IN, F_HID, F_OUT, R = 200, 48, 32, 8, 3

    key = jax.random.PRNGKey(0)
    k_x, k_a, k_w1, k_w2, k_b1, k_b2 = jax.random.split(key, 6)

    x = jax.random.normal(k_x, (N, F_IN), dtype=jnp.float32)
    adjs = jax.random.bernoulli(k_a, p=0.15, shape=(R, N, N)).astype(jnp.float32)

    def glorot(k, shape):
        limit = (6.0 / (shape[-2] + shape[-1])) ** 0.5
        return jax.random.uniform(k, shape, jnp.float32, -limit, limit)

    w1 = glorot(k_w1, (R, F_IN, F_HID))
    w2 = glorot(k_w2, (R, F_HID, F_OUT))
    b1 = 0.01 * jax.random.normal(k_b1, (R, F_HID), dtype=jnp.float32)
    b2 = 0.01 * jax.random.normal(k_b2, (R, F_OUT), dtype=jnp.float32)

    fwd = jax.jit(hetero_gcn_citeseer)
    out = jax.block_until_ready(fwd(x, adjs, w1, b1, w2, b2))
    ref = hetero_gcn_reference(x, adjs, w1, b1, w2, b2)

    assert out.shape == (N, F_OUT)
    # A is exact (0/1 int8->bf16); only the bf16 cast of Y contributes ~0.4%
    # relative drift vs the f32 reference.
    assert jnp.allclose(out, ref, atol=5e-2, rtol=5e-2), (
        float(jnp.max(jnp.abs(out - ref))))
    print("KERNEL_OK")
</pallas_src>

<mosaic_0001>
module attributes {stable_mosaic.version = 11 : i64} {
  func.func @_hgc_kernel(%arg0: i32, %arg1: i32, %arg2: memref<1x128x256xi8, #tpu.memory_space<vmem>>, %arg3: memref<3x256x128xbf16, #tpu.memory_space<vmem>>, %arg4: memref<1x128x1xf32, #tpu.memory_space<vmem>>, %arg5: memref<1x128xf32, #tpu.memory_space<vmem>>, %arg6: memref<128x128xf32, #tpu.memory_space<vmem>>) attributes {dimension_semantics = [#tpu.dimension_semantics<parallel>, #tpu.dimension_semantics<arbitrary>], iteration_bounds = array<i64: 2, 3>, scalar_prefetch = 0 : i64, scratch_operands = 0 : i64, tpu.core_type = #tpu.core_type<tc>, window_params = [{transform_indices = @transform_0, window_bounds = array<i64: 1, 128, 256>}, {pipeline_mode = #tpu.pipeline_mode<synchronous>, transform_indices = @transform_1, window_bounds = array<i64: 3, 256, 128>}, {transform_indices = @transform_2, window_bounds = array<i64: 1, 128, 1>}, {pipeline_mode = #tpu.pipeline_mode<synchronous>, transform_indices = @transform_3, window_bounds = array<i64: 1, 128>}, {transform_indices = @transform_4, window_bounds = array<i64: 128, 128>}]} {
    %c0_i32 = arith.constant 0 : i32
    %0 = arith.cmpi eq, %arg1, %c0_i32 : i32
    %1 = arith.extui %0 : i1 to i32
    %c0_i32_0 = arith.constant 0 : i32
    %2 = arith.cmpi ne, %1, %c0_i32_0 : i32
    scf.if %2 {
      %c0_13 = arith.constant 0 : index
      %c0_14 = arith.constant 0 : index
      %21 = vector.load %arg5[%c0_13, %c0_14] : memref<1x128xf32, #tpu.memory_space<vmem>>, vector<1x128xf32>
      %22 = vector.shape_cast %21 : vector<1x128xf32> to vector<1x128xf32>
      %23 = vector.broadcast %22 : vector<1x128xf32> to vector<128x128xf32>
      %c0_15 = arith.constant 0 : index
      %c0_16 = arith.constant 0 : index
      %24 = vector.load %arg6[%c0_15, %c0_16] : memref<128x128xf32, #tpu.memory_space<vmem>>, vector<128x128xf32>
      tpu.vector_store %arg6[%c0_15, %c0_16], %23 {strides = array<i32>} : memref<128x128xf32, #tpu.memory_space<vmem>>, vector<128x128xf32>,
    } else {
    }
    %c0 = arith.constant 0 : index
    %c0_1 = arith.constant 0 : index
    %c0_2 = arith.constant 0 : index
    %3 = vector.load %arg2[%c0, %c0_1, %c0_2] : memref<1x128x256xi8, #tpu.memory_space<vmem>>, vector<1x128x256xi8>
    %4 = vector.shape_cast %3 : vector<1x128x256xi8> to vector<128x256xi8>
    %5 = arith.sitofp %4 : vector<128x256xi8> to vector<128x256xf32>
    %6 = arith.truncf %5 : vector<128x256xf32> to vector<128x256xbf16>
    %7 = arith.index_cast %arg1 : i32 to index
    %c0_3 = arith.constant 0 : index
    %c0_4 = arith.constant 0 : index
    %8 = vector.load %arg3[%7, %c0_3, %c0_4] : memref<3x256x128xbf16, #tpu.memory_space<vmem>>, vector<1x256x128xbf16>
    %9 = vector.shape_cast %8 : vector<1x256x128xbf16> to vector<256x128xbf16>
    %cst = arith.constant dense<0.000000e+00> : vector<128x128xf32>
    %10 = tpu.matmul %6, %9, %cst {dimension_numbers = #tpu.dot_dimension_numbers<[1], [0], [0], [1], [0, 0, 1, 1], [], []>} : vector<128x256xbf16>, vector<256x128xbf16>, vector<128x128xf32> -> vector<128x128xf32>
    %c0_5 = arith.constant 0 : index
    %c0_6 = arith.constant 0 : index
    %11 = vector.load %arg6[%c0_5, %c0_6] : memref<128x128xf32, #tpu.memory_space<vmem>>, vector<128x128xf32>
    %c0_7 = arith.constant 0 : index
    %c0_8 = arith.constant 0 : index
    %c0_9 = arith.constant 0 : index
    %12 = vector.load %arg4[%c0_7, %c0_8, %c0_9] : memref<1x128x1xf32, #tpu.memory_space<vmem>>, vector<1x128x1xf32>
    %13 = vector.shape_cast %12 : vector<1x128x1xf32> to vector<128x1xf32>
    %14 = vector.broadcast %13 : vector<128x1xf32> to vector<128x128xf32>
    %15 = arith.mulf %10, %14 : vector<128x128xf32>
    %16 = arith.addf %11, %15 : vector<128x128xf32>
    %c0_10 = arith.constant 0 : index
    %c0_11 = arith.constant 0 : index
    %17 = vector.load %arg6[%c0_10, %c0_11] : memref<128x128xf32, #tpu.memory_space<vmem>>, vector<128x128xf32>
    tpu.vector_store %arg6[%c0_10, %c0_11], %16 {strides = array<i32>} : memref<128x128xf32, #tpu.memory_space<vmem>>, vector<128x128xf32>,
    %c2_i32 = arith.constant 2 : i32
    %18 = arith.cmpi eq, %arg1, %c2_i32 : i32
    %19 = arith.extui %18 : i1 to i32
    %c0_i32_12 = arith.constant 0 : i32
    %20 = arith.cmpi ne, %19, %c0_i32_12 : i32
    scf.if %20 {
      %c0_13 = arith.constant 0 : index
      %c0_14 = arith.constant 0 : index
      %21 = vector.load %arg6[%c0_13, %c0_14] : memref<128x128xf32, #tpu.memory_space<vmem>>, vector<128x128xf32>
      %cst_15 = arith.constant 0.000000e+00 : f32
      %22 = vector.broadcast %cst_15 : f32 to vector<128x128xf32>
      %23 = arith.maximumf %21, %22 : vector<128x128xf32>
      %c0_16 = arith.constant 0 : index
      %c0_17 = arith.constant 0 : index
      %24 = vector.load %arg6[%c0_16, %c0_17] : memref<128x128xf32, #tpu.memory_space<vmem>>, vector<128x128xf32>
      tpu.vector_store %arg6[%c0_16, %c0_17], %23 {strides = array<i32>} : memref<128x128xf32, #tpu.memory_space<vmem>>, vector<128x128xf32>,
    } else {
    }
    return
  }
  func.func @transform_0(%arg0: i32, %arg1: i32) -> (i32, i32, i32) {
    %c0_i32 = arith.constant 0 : i32
    %c0_i32_0 = arith.constant 0 : i32
    return %arg1, %arg0, %c0_i32 : i32, i32, i32
  }
  func.func @transform_1(%arg0: i32, %arg1: i32) -> (i32, i32, i32) {
    %c0_i32 = arith.constant 0 : i32
    %c0_i32_0 = arith.constant 0 : i32
    %c0_i32_1 = arith.constant 0 : i32
    %c0_i32_2 = arith.constant 0 : i32
    return %c0_i32, %c0_i32_0, %c0_i32_1 : i32, i32, i32
  }
  func.func @transform_2(%arg0: i32, %arg1: i32) -> (i32, i32, i32) {
    %c0_i32 = arith.constant 0 : i32
    %c0_i32_0 = arith.constant 0 : i32
    return %arg1, %arg0, %c0_i32 : i32, i32, i32
  }
  func.func @transform_3(%arg0: i32, %arg1: i32) -> (i32, i32) {
    %c0_i32 = arith.constant 0 : i32
    %c0_i32_0 = arith.constant 0 : i32
    %c0_i32_1 = arith.constant 0 : i32
    return %c0_i32, %c0_i32_0 : i32, i32
  }
  func.func @transform_4(%arg0: i32, %arg1: i32) -> (i32, i32) {
    %c0_i32 = arith.constant 0 : i32
    %c0_i32_0 = arith.constant 0 : i32
    return %arg0, %c0_i32 : i32, i32
  }
}

module attributes {stable_mosaic.version = 11 : i64} {
  func.func @_hgc_kernel(%arg0: i32, %arg1: i32, %arg2: memref<1x128x256xi8, #tpu.memory_space<vmem>>, %arg3: memref<3x256x128xbf16, #tpu.memory_space<vmem>>, %arg4: memref<1x128x1xf32, #tpu.memory_space<vmem>>, %arg5: memref<1x128xf32, #tpu.memory_space<vmem>>, %arg6: memref<128x128xf32, #tpu.memory_space<vmem>>) attributes {dimension_semantics = [#tpu.dimension_semantics<parallel>, #tpu.dimension_semantics<arbitrary>], iteration_bounds = array<i64: 2, 3>, scalar_prefetch = 0 : i64, scratch_operands = 0 : i64, tpu.core_type = #tpu.core_type<tc>, window_params = [{transform_indices = @transform_0, window_bounds = array<i64: 1, 128, 256>}, {pipeline_mode = #tpu.pipeline_mode<synchronous>, transform_indices = @transform_1, window_bounds = array<i64: 3, 256, 128>}, {transform_indices = @transform_2, window_bounds = array<i64: 1, 128, 1>}, {pipeline_mode = #tpu.pipeline_mode<synchronous>, transform_indices = @transform_3, window_bounds = array<i64: 1, 128>}, {transform_indices = @transform_4, window_bounds = array<i64: 128, 128>}]} {
    %c0_i32 = arith.constant 0 : i32
    %0 = arith.cmpi eq, %arg1, %c0_i32 : i32
    %1 = arith.extui %0 : i1 to i32
    %c0_i32_0 = arith.constant 0 : i32
    %2 = arith.cmpi ne, %1, %c0_i32_0 : i32
    scf.if %2 {
      %c0_12 = arith.constant 0 : index
      %c0_13 = arith.constant 0 : index
      %18 = vector.load %arg5[%c0_12, %c0_13] : memref<1x128xf32, #tpu.memory_space<vmem>>, vector<1x128xf32>
      %19 = vector.shape_cast %18 : vector<1x128xf32> to vector<1x128xf32>
      %20 = vector.broadcast %19 : vector<1x128xf32> to vector<128x128xf32>
      %c0_14 = arith.constant 0 : index
      %c0_15 = arith.constant 0 : index
      %21 = vector.load %arg6[%c0_14, %c0_15] : memref<128x128xf32, #tpu.memory_space<vmem>>, vector<128x128xf32>
      tpu.vector_store %arg6[%c0_14, %c0_15], %20 {strides = array<i32>} : memref<128x128xf32, #tpu.memory_space<vmem>>, vector<128x128xf32>,
    } else {
    }
    %c0 = arith.constant 0 : index
    %c0_1 = arith.constant 0 : index
    %c0_2 = arith.constant 0 : index
    %3 = vector.load %arg2[%c0, %c0_1, %c0_2] : memref<1x128x256xi8, #tpu.memory_space<vmem>>, vector<1x128x256xi8>
    %4 = vector.shape_cast %3 : vector<1x128x256xi8> to vector<128x256xi8>
    %5 = arith.sitofp %4 : vector<128x256xi8> to vector<128x256xf32>
    %6 = arith.truncf %5 : vector<128x256xf32> to vector<128x256xbf16>
    %7 = arith.index_cast %arg1 : i32 to index
    %c0_3 = arith.constant 0 : index
    %c0_4 = arith.constant 0 : index
    %8 = vector.load %arg3[%7, %c0_3, %c0_4] : memref<3x256x128xbf16, #tpu.memory_space<vmem>>, vector<1x256x128xbf16>
    %9 = vector.shape_cast %8 : vector<1x256x128xbf16> to vector<256x128xbf16>
    %cst = arith.constant dense<0.000000e+00> : vector<128x128xf32>
    %10 = tpu.matmul %6, %9, %cst {dimension_numbers = #tpu.dot_dimension_numbers<[1], [0], [0], [1], [0, 0, 1, 1], [], []>} : vector<128x256xbf16>, vector<256x128xbf16>, vector<128x128xf32> -> vector<128x128xf32>
    %c0_5 = arith.constant 0 : index
    %c0_6 = arith.constant 0 : index
    %11 = vector.load %arg6[%c0_5, %c0_6] : memref<128x128xf32, #tpu.memory_space<vmem>>, vector<128x128xf32>
    %c0_7 = arith.constant 0 : index
    %c0_8 = arith.constant 0 : index
    %c0_9 = arith.constant 0 : index
    %12 = vector.load %arg4[%c0_7, %c0_8, %c0_9] : memref<1x128x1xf32, #tpu.memory_space<vmem>>, vector<1x128x1xf32>
    %13 = vector.shape_cast %12 : vector<1x128x1xf32> to vector<128x1xf32>
    %14 = vector.broadcast %13 : vector<128x1xf32> to vector<128x128xf32>
    %15 = arith.mulf %10, %14 : vector<128x128xf32>
    %16 = arith.addf %11, %15 : vector<128x128xf32>
    %c0_10 = arith.constant 0 : index
    %c0_11 = arith.constant 0 : index
    %17 = vector.load %arg6[%c0_10, %c0_11] : memref<128x128xf32, #tpu.memory_space<vmem>>, vector<128x128xf32>
    tpu.vector_store %arg6[%c0_10, %c0_11], %16 {strides = array<i32>} : memref<128x128xf32, #tpu.memory_space<vmem>>, vector<128x128xf32>,
    return
  }
  func.func @transform_0(%arg0: i32, %arg1: i32) -> (i32, i32, i32) {
    %c0_i32 = arith.constant 0 : i32
    %c0_i32_0 = arith.constant 0 : i32
    return %arg1, %arg0, %c0_i32 : i32, i32, i32
  }
  func.func @transform_1(%arg0: i32, %arg1: i32) -> (i32, i32, i32) {
    %c0_i32 = arith.constant 0 : i32
    %c0_i32_0 = arith.constant 0 : i32
    %c0_i32_1 = arith.constant 0 : i32
    %c0_i32_2 = arith.constant 0 : i32
    return %c0_i32, %c0_i32_0, %c0_i32_1 : i32, i32, i32
  }
  func.func @transform_2(%arg0: i32, %arg1: i32) -> (i32, i32, i32) {
    %c0_i32 = arith.constant 0 : i32
    %c0_i32_0 = arith.constant 0 : i32
    return %arg1, %arg0, %c0_i32 : i32, i32, i32
  }
  func.func @transform_3(%arg0: i32, %arg1: i32) -> (i32, i32) {
    %c0_i32 = arith.constant 0 : i32
    %c0_i32_0 = arith.constant 0 : i32
    %c0_i32_1 = arith.constant 0 : i32
    return %c0_i32, %c0_i32_0 : i32, i32
  }
  func.func @transform_4(%arg0: i32, %arg1: i32) -> (i32, i32) {
    %c0_i32 = arith.constant 0 : i32
    %c0_i32_0 = arith.constant 0 : i32
    return %arg0, %c0_i32 : i32, i32
  }
}

</mosaic_0001>

<bundles_post_ra>
// kernel: hetero_gcn_citeseer.2
= control target key start
LH: loop header
LB: loop body
LE: loop exit
PB: predicated region body
PF: predicated region fallthrough
CT: control target
= control target key end

     0   :  { %s1098_s15 = smov 0   ;;  %s1100_s16 = smov 0   ;;  %s1313_s0 = inlined_call_operand.vmem [shape: s8[3,256,256], index: 0, kind: input, shape index: {}]   ;;  %s1314_s1 = inlined_call_operand.vmem [shape: bf16[3,256,128], index: 1, kind: input, shape index: {}]   ;;  %s1315_s2 = inlined_call_operand.vmem [shape: f32[3,256,1], index: 2, kind: input, shape index: {}]   ;;  %s1316_s3 = inlined_call_operand.vmem [shape: f32[1,128], index: 3, kind: input, shape index: {}]   ;;  %s1317_s4 = inlined_call_operand.vmem [shape: f32[256,128], index: 4, kind: output, shape index: {}]  }
   0x1   :  { %s1102_s17 = smov 0   ;;  %s1104_s18 = smov 0  }
   0x2   :  { %s1106_s19 = smov 0  }
   0x3 LB: > { %s23_s20 = sadd.s32 1, %s1062_s17  ;;  %s26_s21 = sadd.s32 1, %s1066_s18  ;;  %s1070_s19 = sphi %s1106_s19, %s14_s19   ;;  %s1066_s18 = sphi %s1104_s18, %s1321_s18   ;;  %s1062_s17 = sphi %s1102_s17, %s1320_s17   ;;  %s1058_s16 = sphi %s1100_s16, %s1319_s16   ;;  %s1054_s15 = sphi %s1098_s15, %s1318_s15  }
   0x4   : > { %p24_p0 = scmp.ge.s32.totalorder %s23_s20, 3  ;;  %p859_p1 = scmp.ge.s32.totalorder %s1070_s19, 1 }
   0x5   : > { %p199_p2 = scmp.lt.s32.totalorder %s1070_s19, 7 }
   0x6   : > { %s1323_s20 = smov (%p24_p0, %s23_s20), 0  ;;  %s1325_s21 = smov (!%p24_p0, %s26_s21), %s1066_s18 }
   0x7   : > { %p200_p3 = pnand %p859_p1, %p199_p2  ;;  %p28_p4 = scmp.ge.s32.totalorder %s1325_s21, 2 }
   0x8   : > { %s860_s22 = sshll.u32 (!%p200_p3), %s1058_s16, 2  ;;  %p240_p5 = scmp.lt.s32.totalorder (!%p200_p3), %s1054_s15, 2 }
   0x9   : > { %s1327_s21 = smov (%p28_p4, %s1325_s21), 0  ;;  %203 = sbr.rel (%p200_p3) target bundleno = 324 (0x144), region = 36 }
   0xa   : > { %p242_p6 = scmp.lt.s32.totalorder (!%p200_p3), %s860_s22, 7  ;;  %s864_s23 = sshll.u32 (!%p200_p3), %s1058_s16, 4 }
   0xb   : > { %p253_p7 = scmp.lt.s32.totalorder (!%p200_p3), %s864_s23, 31  ;;  %p869_p8 = scmp.ne.s32.totalorder (!%p200_p3), %s1054_s15, 0 }
  0x10   : > { %s241_s24 = scalar_select %p240_p5, %s1054_s15, 2 }
  0x11   : > { %s1329_s22 = smov (!%p242_p6, %s860_s22), 7  ;;  %s1331_s23 = smov (!%p253_p7, %s864_s23), 31 }
  0x12   : > { %s862_s25 = sshll.u32 %s241_s24, 4  ;;  %s861_s26 = sshll.u32 %s1329_s22, 1  ;;  %v870_v0 = vld [vmem:[%s1316_s3] ss:$0 sm:$0xff] (!%p869_p8) }
  0x13   : > { %s246_s27 = sadd.s32 %s862_s25, %s861_s26  ;;  %s865_s6 = sshll.u32 %s241_s24, 5 }
  0x14   : > { %s863_s28 = sshll.u32 %s246_s27, 3  ;;  %s256_s7 = sadd.s32 %s865_s6, %s1331_s23 }
  0x15   : > { %s1135_s5 = scalar_lea.vmem %s1313_s0, %s863_s28  ;;  %s868_s8 = sshll.u32 %s1331_s23, 3 }
  0x16   : > { %s866_s9 = sshll.u32 %s256_s7, 3  ;;  %s1140_s12 = scalar_lea.vmem %s1317_s4, %s868_s8 }
  0x17   : > { %s1145_s16 = scalar_lea.vmem %s1315_s2, %s866_s9  ;;  %270 = sbr.rel (%p869_p8) target bundleno = 31 (0x1f), region = 40  ;;  %278 = vst [vmem:[%s1140_s12] sm:$0xff] (!%p869_p8), %v870_v0  ;;  %279 = vst [vmem:[%s1140_s12 + $0x8] sm:$0xff] (!%p869_p8), %v870_v0 }
  0x18   : > { %280 = vst [vmem:[%s1140_s12 + $0x10] sm:$0xff] (!%p869_p8), %v870_v0  ;;  %281 = vst [vmem:[%s1140_s12 + $0x18] sm:$0xff] (!%p869_p8), %v870_v0 }
  0x19   : > { %282 = vst [vmem:[%s1140_s12 + $0x20] sm:$0xff] (!%p869_p8), %v870_v0  ;;  %283 = vst [vmem:[%s1140_s12 + $0x28] sm:$0xff] (!%p869_p8), %v870_v0 }
  0x1a   : > { %284 = vst [vmem:[%s1140_s12 + $0x30] sm:$0xff] (!%p869_p8), %v870_v0  ;;  %285 = vst [vmem:[%s1140_s12 + $0x38] sm:$0xff] (!%p869_p8), %v870_v0 }
  0x1b   : > { %286 = vst [vmem:[%s1140_s12 + $0x40] sm:$0xff] (!%p869_p8), %v870_v0  ;;  %287 = vst [vmem:[%s1140_s12 + $0x48] sm:$0xff] (!%p869_p8), %v870_v0 }
  0x1c   : > { %288 = vst [vmem:[%s1140_s12 + $0x50] sm:$0xff] (!%p869_p8), %v870_v0  ;;  %289 = vst [vmem:[%s1140_s12 + $0x58] sm:$0xff] (!%p869_p8), %v870_v0 }
  0x1d   : > { %290 = vst [vmem:[%s1140_s12 + $0x60] sm:$0xff] (!%p869_p8), %v870_v0  ;;  %291 = vst [vmem:[%s1140_s12 + $0x68] sm:$0xff] (!%p869_p8), %v870_v0 }
  0x1e   : > { %292 = vst [vmem:[%s1140_s12 + $0x70] sm:$0xff] %v870_v0  ;;  %293 = vst [vmem:[%s1140_s12 + $0x78] sm:$0xff] %v870_v0 }
  0x1f PF: > { %s892_s23 = sshll.u32 %s1054_s15, 7  ;;  %v1169_v1 = vld [vmem:[%s1135_s5 + $0x8] sm:$0xff]  ;;  %v1072_v5 = vmov 0   ;;  %v564_v17 = vld [vmem:[%s1145_s16 + $0x10] sm:$0xff]  ;;  %v562_v18 = vld [vmem:[%s1145_s16] sm:$0xff]  ;;  %p889_p9 = scmp.ne.s32.totalorder %s1054_s15, 2 }
  0x20   : > { %v1172_v2 = vld [vmem:[%s1135_s5 + $0x28] sm:$0xff]  ;;  %s1177_s27 = scalar_lea.vmem %s1314_s1, %s892_s23  ;;  %v303_v3 = vunpack.c.l.s8.bf16 %v1169_v1  ;;  %1015 = vset.pattern.permute.xlu1 %v1072_v5  ;;  %1014 = vset.pattern.permute.xlu0 %v1072_v5  ;;  %v565_v19 = vld [vmem:[%s1145_s16 + $0x18] sm:$0xff]  ;;  %v566_v25 = vld [vmem:[%s1145_s16 + $0x20] sm:$0xff]  ;;  %v305_v35 = vunpack.c.h.s8.bf16 %v1169_v1 }
  0x21   : > { %v311_v4 = vunpack.c.l.s8.bf16 %v1172_v2  ;;  %v1016_v6 = vld [vmem:[%s1177_s27 + $0x40] sm:$0xff]   ;;  %v1018_v8 = vld [vmem:[%s1177_s27 + $0x48] sm:$0xff]   ;;  %v1020_v10 = vld [vmem:[%s1177_s27 + $0x50] sm:$0xff]   ;;  %590 = vperm.xlu1 %1015, %v564_v17   ;;  %580 = vperm.xlu0 %1014, %v562_v18   ;;  %v313_v36 = vunpack.c.h.s8.bf16 %v1172_v2 }
  0x22   : > { %v1017_v7 = vld [vmem:[%s1177_s27] sm:$0xff]   ;;  %481 = vmatprep.mubr.bf16.mxu0 %v303_v3  ;;  %893 = vmatprep.subr.bf16.mxu0 %v1016_v6  ;;  %v1019_v9 = vld [vmem:[%s1177_s27 + $0x8] sm:$0xff]   ;;  %v1021_v11 = vld [vmem:[%s1177_s27 + $0x10] sm:$0xff]  }
  0x23   : > { %513 = vmatprep.mubr.bf16.mxu1 %v311_v4  ;;  %957 = vmatprep.subr.bf16.mxu1 %v1016_v6  ;;  %v1022_v12 = vld [vmem:[%s1177_s27 + $0x58] sm:$0xff]   ;;  %v1024_v14 = vld [vmem:[%s1177_s27 + $0x60] sm:$0xff]   ;;  %v1026_v16 = vld [vmem:[%s1177_s27 + $0x68] sm:$0xff]  }
  0x24   : > { %894 = vmatpush3.bf16.msra.mxu0 %v1017_v7  ;;  %965 = vmatpush3.bf16.msra.mxu1 %v1017_v7  ;;  %v1023_v13 = vld [vmem:[%s1177_s27 + $0x18] sm:$0xff]   ;;  %v1025_v15 = vld [vmem:[%s1177_s27 + $0x20] sm:$0xff]   ;;  %v1027_v20 = vld [vmem:[%s1177_s27 + $0x28] sm:$0xff]  }
  0x25   : > { %895 = vmatprep.subr.bf16.mxu0 %v1018_v8  ;;  %958 = vmatprep.subr.bf16.mxu1 %v1018_v8  ;;  %v563_v21 = vld [vmem:[%s1145_s16 + $0x8] sm:$0xff]  ;;  %v1028_v22 = vld [vmem:[%s1177_s27 + $0x70] sm:$0xff]   ;;  %v1030_v26 = vld [vmem:[%s1177_s27 + $0x78] sm:$0xff]  }
  0x26   : > { %595 = vperm.xlu1 %1015, %v565_v19   ;;  %585 = vperm.xlu0 %1014, %v563_v21   ;;  %v567_v23 = vld [vmem:[%s1145_s16 + $0x28] sm:$0xff]  ;;  %v1029_v24 = vld [vmem:[%s1177_s27 + $0x30] sm:$0xff]   ;;  %v294_v27 = vld [vmem:[%s1135_s5] sm:$0xff] }
  0x27   : > { %v569_v28 = vld [vmem:[%s1145_s16 + $0x38] sm:$0xff]  ;;  %v298_v30 = vld [vmem:[%s1135_s5 + $0x20] sm:$0xff]  ;;  %v568_v31 = vld [vmem:[%s1145_s16 + $0x30] sm:$0xff]  ;;  %v302_v32 = vunpack.c.l.s8.bf16 %v294_v27  ;;  %v304_v42 = vunpack.c.h.s8.bf16 %v294_v27 }
  0x28   : > { %896 = vmatpush3.bf16.msra.mxu0 %v1019_v9  ;;  %966 = vmatpush3.bf16.msra.mxu1 %v1019_v9  ;;  %v1031_v29 = vld [vmem:[%s1177_s27 + $0x38] sm:$0xff]   ;;  %v310_v33 = vunpack.c.l.s8.bf16 %v298_v30  ;;  %v571_v34 = vld [vmem:[%s1145_s16 + $0x48] sm:$0xff]  ;;  %v570_v37 = vld [vmem:[%s1145_s16 + $0x40] sm:$0xff]  ;;  %v312_v43 = vunpack.c.h.s8.bf16 %v298_v30 }
  0x29   : > { %897 = vmatprep.subr.bf16.mxu0 %v1020_v10  ;;  %959 = vmatprep.subr.bf16.mxu1 %v1020_v10  ;;  %v573_v38 = vld [vmem:[%s1145_s16 + $0x58] sm:$0xff]  ;;  %v572_v41 = vld [vmem:[%s1145_s16 + $0x50] sm:$0xff]  ;;  %v575_v44 = vld [vmem:[%s1145_s16 + $0x68] sm:$0xff] }
  0x2a   : > { %605 = vperm.xlu1 %1015, %v567_v23   ;;  %600 = vperm.xlu0 %1014, %v566_v25   ;;  %v297_v39 = vld [vmem:[%s1135_s5 + $0x18] sm:$0xff]  ;;  %v574_v47 = vld [vmem:[%s1145_s16 + $0x60] sm:$0xff]  ;;  %v296_v49 = vld [vmem:[%s1135_s5 + $0x10] sm:$0xff] }
  0x2b   : > { %v301_v40 = vld [vmem:[%s1135_s5 + $0x38] sm:$0xff]  ;;  %v307_v45 = vunpack.c.l.s8.bf16 %v297_v39  ;;  %v300_v50 = vld [vmem:[%s1135_s5 + $0x30] sm:$0xff]  ;;  %v306_v52 = vunpack.c.l.s8.bf16 %v296_v49  ;;  %v309_v54 = vunpack.c.h.s8.bf16 %v297_v39  ;;  %v308_v56 = vunpack.c.h.s8.bf16 %v296_v49  ;;  %v555_v21 = vld [vmem:[%s1140_s12 + $0x48] sm:$0xff] }
  0x2c   : > { %898 = vmatpush3.bf16.msra.mxu0 %v1021_v11  ;;  %967 = vmatpush3.bf16.msra.mxu1 %v1021_v11  ;;  %v315_v46 = vunpack.c.l.s8.bf16 %v301_v40  ;;  %v577_v48 = vld [vmem:[%s1145_s16 + $0x78] sm:$0xff]  ;;  %v576_v51 = vld [vmem:[%s1145_s16 + $0x70] sm:$0xff]  ;;  %v314_v53 = vunpack.c.l.s8.bf16 %v300_v50  ;;  %v317_v55 = vunpack.c.h.s8.bf16 %v301_v40  ;;  %v316_v57 = vunpack.c.h.s8.bf16 %v300_v50  ;;  %v546_v11 = vld [vmem:[%s1140_s12] sm:$0xff] }
  0x2d   : > { %899 = vmatprep.subr.bf16.mxu0 %v1022_v12  ;;  %960 = vmatprep.subr.bf16.mxu1 %v1022_v12  ;;  %v554_v12 = vld [vmem:[%s1140_s12 + $0x40] sm:$0xff] }
  0x2e   : > { %615 = vperm.xlu1 %1015, %v569_v28   ;;  %610 = vperm.xlu0 %1014, %v568_v31  }
  0x30   : > { %900 = vmatpush3.bf16.msra.mxu0 %v1023_v13  ;;  %968 = vmatpush3.bf16.msra.mxu1 %v1023_v13 }
  0x31   : > { %901 = vmatprep.subr.bf16.mxu0 %v1024_v14  ;;  %961 = vmatprep.subr.bf16.mxu1 %v1024_v14 }
  0x32   : > { %625 = vperm.xlu1 %1015, %v571_v34   ;;  %620 = vperm.xlu0 %1014, %v570_v37   ;;  %v548_v37 = vld [vmem:[%s1140_s12 + $0x10] sm:$0xff] }
  0x34   : > { %902 = vmatpush3.bf16.msra.mxu0 %v1025_v15  ;;  %969 = vmatpush3.bf16.msra.mxu1 %v1025_v15 }
  0x35   : > { %903 = vmatprep.subr.bf16.mxu0 %v1026_v16  ;;  %962 = vmatprep.subr.bf16.mxu1 %v1026_v16 }
  0x36   : > { %635 = vperm.xlu1 %1015, %v573_v38   ;;  %630 = vperm.xlu0 %1014, %v572_v41   ;;  %v556_v38 = vld [vmem:[%s1140_s12 + $0x50] sm:$0xff] }
  0x38   : > { %904 = vmatpush3.bf16.msra.mxu0 %v1027_v20  ;;  %970 = vmatpush3.bf16.msra.mxu1 %v1027_v20  ;;  %v547_v20 = vld [vmem:[%s1140_s12 + $0x8] sm:$0xff] }
  0x39   : > { %905 = vmatprep.subr.bf16.mxu0 %v1028_v22  ;;  %963 = vmatprep.subr.bf16.mxu1 %v1028_v22 }
  0x3a   : > { %645 = vperm.xlu1 %1015, %v575_v44   ;;  %640 = vperm.xlu0 %1014, %v574_v47   ;;  %v557_v47 = vld [vmem:[%s1140_s12 + $0x58] sm:$0xff] }
  0x3c   : > { %906 = vmatpush3.bf16.msra.mxu0 %v1029_v24  ;;  %971 = vmatpush3.bf16.msra.mxu1 %v1029_v24 }
  0x3d   : > { %907 = vmatprep.subr.bf16.mxu0 %v1030_v26  ;;  %964 = vmatprep.subr.bf16.mxu1 %v1030_v26 }
  0x3e   : > { %655 = vperm.xlu1 %1015, %v577_v48   ;;  %650 = vperm.xlu0 %1014, %v576_v51  }
  0x40   : > { %908 = vmatpush3.bf16.msra.mxu0 %v1031_v29  ;;  %972 = vmatpush3.bf16.msra.mxu1 %v1031_v29 }
  0x43   : > { %482 = vmatmul.mubr.bf16.vlgmr.msra.gmra.mrb[0].mxu0 %v302_v32  ;;  %514 = vmatmul.mubr.bf16.vlgmr.msra.gmra.mrb[0].mxu1 %v310_v33 }
  0x44   : > { %489 = vmatprep.mubr.bf16.mxu0 %v305_v35  ;;  %521 = vmatprep.mubr.bf16.mxu1 %v313_v36 }
  0x4b   : > { %490 = vmatmul.mubr.bf16.gmra.mrb[4].mxu0 %v304_v42  ;;  %522 = vmatmul.mubr.bf16.gmra.mrb[4].mxu1 %v312_v43 }
  0x4c   : > { %497 = vmatprep.mubr.bf16.mxu0 %v307_v45  ;;  %529 = vmatprep.mubr.bf16.mxu1 %v315_v46  ;;  %v549_v46 = vld [vmem:[%s1140_s12 + $0x18] sm:$0xff] }
  0x53   : > { %498 = vmatmul.mubr.bf16.gmra.mrb[8].mxu0 %v306_v52  ;;  %530 = vmatmul.mubr.bf16.gmra.mrb[8].mxu1 %v314_v53 }
  0x54   : > { %505 = vmatprep.mubr.bf16.mxu0 %v309_v54  ;;  %537 = vmatprep.mubr.bf16.mxu1 %v317_v55 }
  0x5b   : > { %506 = vmatmul.mubr.bf16.gmra.mrb[12].mxu0 %v308_v56  ;;  %538 = vmatmul.mubr.bf16.gmra.mrb[12].mxu1 %v316_v57 }
  0xa0   : > { %v581_v58 = vpop.permute.xlu0 %580  ;;  %v591_v59 = vpop.permute.xlu1 %590 }
  0xa5   : > { %v586_v60 = vpop.permute.xlu0 %585  ;;  %v596_v61 = vpop.permute.xlu1 %595 }
  0xa9   : > { %v1221_v62 = vpop.permute.xlu0 %600  ;;  %v1223_v63 = vpop.permute.xlu1 %605 }
  0xad   : > { %v1225_v0 = vpop.permute.xlu0 %610  ;;  %v1227_v1 = vpop.permute.xlu1 %615 }
  0xb1   : > { %v621_v2 = vpop.permute.xlu0 %620  ;;  %v626_v19 = vpop.permute.xlu1 %625 }
  0xb5   : > { %v631_v26 = vpop.permute.xlu0 %630  ;;  %v636_v45 = vpop.permute.xlu1 %635 }
  0xb9   : > { %v641_v52 = vpop.permute.xlu0 %640 }
 0x116   : > { %v909_v3 = vpop.f32.mrb[0].mxu0  ;;  %v933_v4 = vpop.f32.mrb[0].mxu1 }
 0x117   : > { %v910_v5 = vpop.f32.mrb[1].mxu0  ;;  %v934_v6 = vpop.f32.mrb[1].mxu1 }
 0x118   : > { %v911_v7 = vadd.f32 %v910_v5, %v909_v3  ;;  %v935_v8 = vadd.f32 %v934_v6, %v933_v4  ;;  %v912_v9 = vpop.f32.mrb[2].mxu0  ;;  %v936_v10 = vpop.f32.mrb[2].mxu1  ;;  %v550_v3 = vld [vmem:[%s1140_s12 + $0x20] sm:$0xff] }
 0x119   : > { %v913_v13 = vpop.f32.mrb[3].mxu0  ;;  %v937_v14 = vpop.f32.mrb[3].mxu1  ;;  %v558_v4 = vld [vmem:[%s1140_s12 + $0x60] sm:$0xff] }
 0x11a   : > { %v658_v15 = vmul.f32 %v911_v7, %v581_v58  ;;  %v666_v16 = vmul.f32 %v935_v8, %v621_v2  ;;  %v914_v17 = vadd.f32 %v913_v13, %v912_v9  ;;  %v938_v18 = vadd.f32 %v937_v14, %v936_v10  ;;  %v559_v13 = vld [vmem:[%s1140_s12 + $0x68] sm:$0xff] }
 0x11c   : > { %v674_v22 = vadd.f32 %v658_v15, %v546_v11  ;;  %v682_v23 = vadd.f32 %v666_v16, %v554_v12  ;;  %v659_v24 = vmul.f32 %v914_v17, %v586_v60  ;;  %v667_v25 = vmul.f32 %v938_v18, %v626_v19  ;;  %v646_v11 = vpop.permute.xlu1 %645  ;;  %v551_v12 = vld [vmem:[%s1140_s12 + $0x28] sm:$0xff]  ;;  %v651_v18 = vpop.permute.xlu0 %650 }
 0x11e   : > { %690 = vst [vmem:[%s1140_s12] sm:$0xff] %v674_v22  ;;  %698 = vst [vmem:[%s1140_s12 + $0x40] sm:$0xff] %v682_v23  ;;  %v675_v27 = vadd.f32 %v659_v24, %v547_v20  ;;  %v683_v28 = vadd.f32 %v667_v25, %v555_v21  ;;  %v915_v29 = vpop.f32.mrb[4].mxu0  ;;  %v939_v30 = vpop.f32.mrb[4].mxu1 }
 0x11f   : > { %v916_v31 = vpop.f32.mrb[5].mxu0  ;;  %v940_v32 = vpop.f32.mrb[5].mxu1 }
 0x120   : > { %691 = vst [vmem:[%s1140_s12 + $0x8] sm:$0xff] %v675_v27  ;;  %699 = vst [vmem:[%s1140_s12 + $0x48] sm:$0xff] %v683_v28  ;;  %v917_v33 = vadd.f32 %v916_v31, %v915_v29  ;;  %v941_v34 = vadd.f32 %v940_v32, %v939_v30  ;;  %v918_v35 = vpop.f32.mrb[6].mxu0  ;;  %v942_v36 = vpop.f32.mrb[6].mxu1  ;;  %v552_v27 = vld [vmem:[%s1140_s12 + $0x30] sm:$0xff] }
 0x121   : > { %v919_v39 = vpop.f32.mrb[7].mxu0  ;;  %v943_v40 = vpop.f32.mrb[7].mxu1  ;;  %v560_v28 = vld [vmem:[%s1140_s12 + $0x70] sm:$0xff] }
 0x122   : > { %v660_v41 = vmul.f32 %v917_v33, %v591_v59  ;;  %v668_v42 = vmul.f32 %v941_v34, %v631_v26  ;;  %v920_v43 = vadd.f32 %v919_v39, %v918_v35  ;;  %v944_v44 = vadd.f32 %v943_v40, %v942_v36  ;;  %v656_v35 = vpop.permute.xlu1 %655  ;;  %v553_v36 = vld [vmem:[%s1140_s12 + $0x38] sm:$0xff] }
 0x124   : > { %v676_v48 = vadd.f32 %v660_v41, %v548_v37  ;;  %v684_v49 = vadd.f32 %v668_v42, %v556_v38  ;;  %v661_v50 = vmul.f32 %v920_v43, %v596_v61  ;;  %v669_v51 = vmul.f32 %v944_v44, %v636_v45  ;;  %v561_v37 = vld [vmem:[%s1140_s12 + $0x78] sm:$0xff] }
 0x126   : > { %692 = vst [vmem:[%s1140_s12 + $0x10] sm:$0xff] %v676_v48  ;;  %700 = vst [vmem:[%s1140_s12 + $0x50] sm:$0xff] %v684_v49  ;;  %v677_v53 = vadd.f32 %v661_v50, %v549_v46  ;;  %v685_v54 = vadd.f32 %v669_v51, %v557_v47  ;;  %v921_v55 = vpop.f32.mrb[8].mxu0  ;;  %v945_v56 = vpop.f32.mrb[8].mxu1 }
 0x127   : > { %v922_v57 = vpop.f32.mrb[9].mxu0  ;;  %v946_v58 = vpop.f32.mrb[9].mxu1 }
 0x128   : > { %693 = vst [vmem:[%s1140_s12 + $0x18] sm:$0xff] %v677_v53  ;;  %701 = vst [vmem:[%s1140_s12 + $0x58] sm:$0xff] %v685_v54  ;;  %v923_v59 = vadd.f32 %v922_v57, %v921_v55  ;;  %v947_v60 = vadd.f32 %v946_v58, %v945_v56  ;;  %v924_v2 = vpop.f32.mrb[10].mxu0  ;;  %v948_v61 = vpop.f32.mrb[10].mxu1  ;;  %v718_v56 = vld [vmem:[%s1140_s12 + $0x40] sm:$0xff] (!%p889_p9) }
 0x129   : > { %v925_v5 = vpop.f32.mrb[11].mxu0  ;;  %v949_v6 = vpop.f32.mrb[11].mxu1 }
 0x12a   : > { %v662_v7 = vmul.f32 %v923_v59, %v1221_v62  ;;  %v670_v8 = vmul.f32 %v947_v60, %v641_v52  ;;  %v926_v9 = vadd.f32 %v925_v5, %v924_v2  ;;  %v950_v10 = vadd.f32 %v949_v6, %v948_v61  ;;  %v719_v60 = vld [vmem:[%s1140_s12 + $0x48] sm:$0xff] (!%p889_p9) }
 0x12b   : > { %v734_v59 = vmax.f32 (!%p889_p9), %v718_v56, 0.0 }
 0x12c   : > { %v678_v14 = vadd.f32 %v662_v7, %v550_v3  ;;  %v686_v15 = vadd.f32 %v670_v8, %v558_v4  ;;  %v663_v16 = vmul.f32 %v926_v9, %v1223_v63  ;;  %v671_v17 = vmul.f32 %v950_v10, %v646_v11 }
 0x12d   : > { %v712_v44 = vld [vmem:[%s1140_s12 + $0x10] sm:$0xff] (!%p889_p9)  ;;  %v735_v3 = vmax.f32 (!%p889_p9), %v719_v60, 0.0  ;;  %750 = vst [vmem:[%s1140_s12 + $0x40] sm:$0xff] (!%p889_p9), %v734_v59 }
 0x12e   : > { %694 = vst [vmem:[%s1140_s12 + $0x20] sm:$0xff] %v678_v14  ;;  %702 = vst [vmem:[%s1140_s12 + $0x60] sm:$0xff] %v686_v15  ;;  %v679_v19 = vadd.f32 %v663_v16, %v551_v12  ;;  %v687_v62 = vadd.f32 %v671_v17, %v559_v13  ;;  %v927_v20 = vpop.f32.mrb[12].mxu0  ;;  %v951_v21 = vpop.f32.mrb[12].mxu1  ;;  %v728_v47 = vmax.f32 (!%p889_p9), %v712_v44, 0.0  ;;  %v720_v2 = vld [vmem:[%s1140_s12 + $0x50] sm:$0xff] (!%p889_p9) }
 0x12f   : > { %v928_v22 = vpop.f32.mrb[13].mxu0  ;;  %v952_v23 = vpop.f32.mrb[13].mxu1  ;;  %v713_v48 = vld [vmem:[%s1140_s12 + $0x18] sm:$0xff] (!%p889_p9)  ;;  %v736_v4 = vmax.f32 (!%p889_p9), %v720_v2, 0.0  ;;  %751 = vst [vmem:[%s1140_s12 + $0x48] sm:$0xff] (!%p889_p9), %v735_v3 }
 0x130   : > { %695 = vst [vmem:[%s1140_s12 + $0x28] sm:$0xff] %v679_v19  ;;  %703 = vst [vmem:[%s1140_s12 + $0x68] sm:$0xff] %v687_v62  ;;  %v929_v24 = vadd.f32 %v928_v22, %v927_v20  ;;  %v953_v25 = vadd.f32 %v952_v23, %v951_v21  ;;  %v930_v26 = vpop.f32.mrb[14].mxu0  ;;  %v954_v63 = vpop.f32.mrb[14].mxu1  ;;  %v729_v51 = vmax.f32 (!%p889_p9), %v713_v48, 0.0  ;;  %v721_v61 = vld [vmem:[%s1140_s12 + $0x58] sm:$0xff] (!%p889_p9) }
 0x131   : > { %v931_v29 = vpop.f32.mrb[15].mxu0  ;;  %v955_v30 = vpop.f32.mrb[15].mxu1  ;;  %744 = vst [vmem:[%s1140_s12 + $0x10] sm:$0xff] (!%p889_p9), %v728_v47  ;;  %v737_v5 = vmax.f32 (!%p889_p9), %v721_v61, 0.0  ;;  %752 = vst [vmem:[%s1140_s12 + $0x50] sm:$0xff] (!%p889_p9), %v736_v4 }
 0x132   : > { %v664_v31 = vmul.f32 %v929_v24, %v1225_v0  ;;  %v672_v32 = vmul.f32 %v953_v25, %v651_v18  ;;  %v932_v33 = vadd.f32 %v931_v29, %v930_v26  ;;  %v956_v34 = vadd.f32 %v955_v30, %v954_v63  ;;  %709 = sbr.rel (%p889_p9) target bundleno = 324 (0x144), region = 44  ;;  %v710_v0 = vld [vmem:[%s1140_s12] sm:$0xff] (!%p889_p9)  ;;  %745 = vst [vmem:[%s1140_s12 + $0x18] sm:$0xff] (!%p889_p9), %v729_v51 }
 0x133   : > { %v726_v45 = vmax.f32 (!%p889_p9), %v710_v0, 0.0  ;;  %753 = vst [vmem:[%s1140_s12 + $0x58] sm:$0xff] (!%p889_p9), %v737_v5 }
 0x134   : > { %v680_v38 = vadd.f32 %v664_v31, %v552_v27  ;;  %v688_v39 = vadd.f32 %v672_v32, %v560_v28  ;;  %v665_v40 = vmul.f32 %v932_v33, %v1227_v1  ;;  %v673_v41 = vmul.f32 %v956_v34, %v656_v35  ;;  %v711_v1 = vld [vmem:[%s1140_s12 + $0x8] sm:$0xff] (!%p889_p9) }
 0x135   : > { %v727_v46 = vmax.f32 (!%p889_p9), %v711_v1, 0.0  ;;  %v714_v49 = vld [vmem:[%s1140_s12 + $0x20] sm:$0xff] (!%p889_p9)  ;;  %742 = vst [vmem:[%s1140_s12] sm:$0xff] (!%p889_p9), %v726_v45 }
 0x136   : > { %696 = vst [vmem:[%s1140_s12 + $0x30] sm:$0xff] %v680_v38  ;;  %704 = vst [vmem:[%s1140_s12 + $0x70] sm:$0xff] %v688_v39  ;;  %v681_v42 = vadd.f32 %v665_v40, %v553_v36  ;;  %v689_v43 = vadd.f32 %v673_v41, %v561_v37  ;;  %v730_v52 = vmax.f32 (!%p889_p9), %v714_v49, 0.0  ;;  %v722_v6 = vld [vmem:[%s1140_s12 + $0x60] sm:$0xff] (!%p889_p9) }
 0x137   : > { %v715_v50 = vld [vmem:[%s1140_s12 + $0x28] sm:$0xff] (!%p889_p9)  ;;  %743 = vst [vmem:[%s1140_s12 + $0x8] sm:$0xff] (!%p889_p9), %v727_v46  ;;  %v738_v9 = vmax.f32 (!%p889_p9), %v722_v6, 0.0 }
 0x138   : > { %697 = vst [vmem:[%s1140_s12 + $0x38] sm:$0xff] %v681_v42  ;;  %705 = vst [vmem:[%s1140_s12 + $0x78] sm:$0xff] %v689_v43  ;;  %v731_v53 = vmax.f32 (!%p889_p9), %v715_v50, 0.0  ;;  %v723_v7 = vld [vmem:[%s1140_s12 + $0x68] sm:$0xff] (!%p889_p9) }
 0x139   : > { %746 = vst [vmem:[%s1140_s12 + $0x20] sm:$0xff] %v730_v52  ;;  %v739_v10 = vmax.f32 %v723_v7, 0.0  ;;  %754 = vst [vmem:[%s1140_s12 + $0x60] sm:$0xff] %v738_v9 }
 0x13a   : > { %747 = vst [vmem:[%s1140_s12 + $0x28] sm:$0xff] %v731_v53 }
 0x13b   : > { %755 = vst [vmem:[%s1140_s12 + $0x68] sm:$0xff] %v739_v10 }
 0x13d   : > { %v716_v54 = vld [vmem:[%s1140_s12 + $0x30] sm:$0xff] }
 0x13e   : > { %v732_v57 = vmax.f32 %v716_v54, 0.0  ;;  %v724_v8 = vld [vmem:[%s1140_s12 + $0x70] sm:$0xff] }
 0x13f   : > { %v717_v55 = vld [vmem:[%s1140_s12 + $0x38] sm:$0xff]  ;;  %v740_v11 = vmax.f32 %v724_v8, 0.0 }
 0x140   : > { %v733_v58 = vmax.f32 %v717_v55, 0.0  ;;  %748 = vst [vmem:[%s1140_s12 + $0x30] sm:$0xff] %v732_v57  ;;  %v725_v12 = vld [vmem:[%s1140_s12 + $0x78] sm:$0xff] }
 0x141   : > { %v741_v13 = vmax.f32 %v725_v12, 0.0  ;;  %756 = vst [vmem:[%s1140_s12 + $0x70] sm:$0xff] %v740_v11 }
 0x142   : > { %749 = vst [vmem:[%s1140_s12 + $0x38] sm:$0xff] %v733_v58 }
 0x143   : > { %757 = vst [vmem:[%s1140_s12 + $0x78] sm:$0xff] %v741_v13 }
 0x144 PF: > { %s14_s19 = sadd.s32 1, %s1070_s19   ;;  %s1318_s15 = smov %s1062_s17 }
 0x145   : > { %p11_p10 = scmp.ge.s32.totalorder %s14_s19, 8   ;;  %s1319_s16 = smov %s1066_s18 }
 0x146   : > { %s1320_s17 = smov %s1323_s20  ;;  %s1321_s18 = smov %s1327_s21 }
 0x147   :  { %13 = sbr.rel (!%p11_p10) target bundleno = 3 (0x3), region = 78 }

// kernel: hetero_gcn_citeseer.3
= control target key start
LH: loop header
LB: loop body
LE: loop exit
PB: predicated region body
PF: predicated region fallthrough
CT: control target
= control target key end

     0   :  { %s1045_s15 = smov 0   ;;  %s1047_s16 = smov 0   ;;  %s1227_s0 = inlined_call_operand.vmem [shape: s8[3,256,256], index: 0, kind: input, shape index: {}]   ;;  %s1228_s1 = inlined_call_operand.vmem [shape: bf16[3,256,128], index: 1, kind: input, shape index: {}]   ;;  %s1229_s2 = inlined_call_operand.vmem [shape: f32[3,256,1], index: 2, kind: input, shape index: {}]   ;;  %s1230_s3 = inlined_call_operand.vmem [shape: f32[1,128], index: 3, kind: input, shape index: {}]   ;;  %s1231_s4 = inlined_call_operand.vmem [shape: f32[256,128], index: 4, kind: output, shape index: {}]  }
   0x1   :  { %s1049_s17 = smov 0   ;;  %s1051_s18 = smov 0  }
   0x2   :  { %s1053_s19 = smov 0  }
   0x3 LB: > { %s23_s20 = sadd.s32 1, %s1009_s17  ;;  %s26_s21 = sadd.s32 1, %s1013_s18  ;;  %s1017_s19 = sphi %s1053_s19, %s14_s19   ;;  %s1013_s18 = sphi %s1051_s18, %s1235_s18   ;;  %s1009_s17 = sphi %s1049_s17, %s1234_s17   ;;  %s1005_s16 = sphi %s1047_s16, %s1233_s16   ;;  %s1001_s15 = sphi %s1045_s15, %s1232_s15  }
   0x4   : > { %p24_p0 = scmp.ge.s32.totalorder %s23_s20, 3  ;;  %p807_p1 = scmp.ge.s32.totalorder %s1017_s19, 1 }
   0x5   : > { %p199_p2 = scmp.lt.s32.totalorder %s1017_s19, 7 }
   0x6   : > { %s1237_s20 = smov (%p24_p0, %s23_s20), 0  ;;  %s1239_s21 = smov (!%p24_p0, %s26_s21), %s1013_s18 }
   0x7   : > { %p200_p3 = pnand %p807_p1, %p199_p2  ;;  %p28_p4 = scmp.ge.s32.totalorder %s1239_s21, 2 }
   0x8   : > { %s808_s22 = sshll.u32 (!%p200_p3), %s1005_s16, 2  ;;  %p240_p5 = scmp.lt.s32.totalorder (!%p200_p3), %s1001_s15, 2 }
   0x9   : > { %s1241_s21 = smov (%p28_p4, %s1239_s21), 0  ;;  %203 = sbr.rel (%p200_p3) target bundleno = 313 (0x139), region = 36 }
   0xa   : > { %p242_p6 = scmp.lt.s32.totalorder (!%p200_p3), %s808_s22, 7  ;;  %s812_s23 = sshll.u32 (!%p200_p3), %s1005_s16, 4 }
   0xb   : > { %p253_p7 = scmp.lt.s32.totalorder (!%p200_p3), %s812_s23, 31  ;;  %p817_p8 = scmp.ne.s32.totalorder (!%p200_p3), %s1001_s15, 0 }
  0x10   : > { %s241_s24 = scalar_select %p240_p5, %s1001_s15, 2 }
  0x11   : > { %s1243_s22 = smov (!%p242_p6, %s808_s22), 7  ;;  %s1245_s23 = smov (!%p253_p7, %s812_s23), 31 }
  0x12   : > { %s810_s25 = sshll.u32 %s241_s24, 4  ;;  %s809_s26 = sshll.u32 %s1243_s22, 1  ;;  %v818_v0 = vld [vmem:[%s1230_s3] ss:$0 sm:$0xff] (!%p817_p8) }
  0x13   : > { %s246_s27 = sadd.s32 %s810_s25, %s809_s26  ;;  %s813_s6 = sshll.u32 %s241_s24, 5 }
  0x14   : > { %s811_s28 = sshll.u32 %s246_s27, 3  ;;  %s256_s7 = sadd.s32 %s813_s6, %s1245_s23 }
  0x15   : > { %s1082_s5 = scalar_lea.vmem %s1227_s0, %s811_s28  ;;  %s816_s8 = sshll.u32 %s1245_s23, 3 }
  0x16   : > { %s814_s9 = sshll.u32 %s256_s7, 3  ;;  %s1087_s12 = scalar_lea.vmem %s1231_s4, %s816_s8 }
  0x17   : > { %s1092_s16 = scalar_lea.vmem %s1229_s2, %s814_s9  ;;  %270 = sbr.rel (%p817_p8) target bundleno = 31 (0x1f), region = 40  ;;  %278 = vst [vmem:[%s1087_s12] sm:$0xff] (!%p817_p8), %v818_v0  ;;  %279 = vst [vmem:[%s1087_s12 + $0x8] sm:$0xff] (!%p817_p8), %v818_v0 }
  0x18   : > { %280 = vst [vmem:[%s1087_s12 + $0x10] sm:$0xff] (!%p817_p8), %v818_v0  ;;  %281 = vst [vmem:[%s1087_s12 + $0x18] sm:$0xff] (!%p817_p8), %v818_v0 }
  0x19   : > { %282 = vst [vmem:[%s1087_s12 + $0x20] sm:$0xff] (!%p817_p8), %v818_v0  ;;  %283 = vst [vmem:[%s1087_s12 + $0x28] sm:$0xff] (!%p817_p8), %v818_v0 }
  0x1a   : > { %284 = vst [vmem:[%s1087_s12 + $0x30] sm:$0xff] (!%p817_p8), %v818_v0  ;;  %285 = vst [vmem:[%s1087_s12 + $0x38] sm:$0xff] (!%p817_p8), %v818_v0 }
  0x1b   : > { %286 = vst [vmem:[%s1087_s12 + $0x40] sm:$0xff] (!%p817_p8), %v818_v0  ;;  %287 = vst [vmem:[%s1087_s12 + $0x48] sm:$0xff] (!%p817_p8), %v818_v0 }
  0x1c   : > { %288 = vst [vmem:[%s1087_s12 + $0x50] sm:$0xff] (!%p817_p8), %v818_v0  ;;  %289 = vst [vmem:[%s1087_s12 + $0x58] sm:$0xff] (!%p817_p8), %v818_v0 }
  0x1d   : > { %290 = vst [vmem:[%s1087_s12 + $0x60] sm:$0xff] (!%p817_p8), %v818_v0  ;;  %291 = vst [vmem:[%s1087_s12 + $0x68] sm:$0xff] (!%p817_p8), %v818_v0 }
  0x1e   : > { %292 = vst [vmem:[%s1087_s12 + $0x70] sm:$0xff] %v818_v0  ;;  %293 = vst [vmem:[%s1087_s12 + $0x78] sm:$0xff] %v818_v0 }
  0x1f PF: > { %s839_s23 = sshll.u32 %s1001_s15, 7  ;;  %v1116_v1 = vld [vmem:[%s1082_s5 + $0x8] sm:$0xff]  ;;  %v1019_v5 = vmov 0   ;;  %v564_v17 = vld [vmem:[%s1092_s16 + $0x10] sm:$0xff]  ;;  %v562_v18 = vld [vmem:[%s1092_s16] sm:$0xff] }
  0x20   : > { %v1119_v2 = vld [vmem:[%s1082_s5 + $0x28] sm:$0xff]  ;;  %s1124_s27 = scalar_lea.vmem %s1228_s1, %s839_s23  ;;  %v303_v3 = vunpack.c.l.s8.bf16 %v1116_v1  ;;  %962 = vset.pattern.permute.xlu1 %v1019_v5  ;;  %961 = vset.pattern.permute.xlu0 %v1019_v5  ;;  %v565_v19 = vld [vmem:[%s1092_s16 + $0x18] sm:$0xff]  ;;  %v566_v25 = vld [vmem:[%s1092_s16 + $0x20] sm:$0xff]  ;;  %v305_v35 = vunpack.c.h.s8.bf16 %v1116_v1 }
  0x21   : > { %v311_v4 = vunpack.c.l.s8.bf16 %v1119_v2  ;;  %v963_v6 = vld [vmem:[%s1124_s27 + $0x40] sm:$0xff]   ;;  %v965_v8 = vld [vmem:[%s1124_s27 + $0x48] sm:$0xff]   ;;  %v967_v10 = vld [vmem:[%s1124_s27 + $0x50] sm:$0xff]   ;;  %590 = vperm.xlu1 %962, %v564_v17   ;;  %580 = vperm.xlu0 %961, %v562_v18   ;;  %v313_v36 = vunpack.c.h.s8.bf16 %v1119_v2 }
  0x22   : > { %v964_v7 = vld [vmem:[%s1124_s27] sm:$0xff]   ;;  %481 = vmatprep.mubr.bf16.mxu0 %v303_v3  ;;  %840 = vmatprep.subr.bf16.mxu0 %v963_v6  ;;  %v966_v9 = vld [vmem:[%s1124_s27 + $0x8] sm:$0xff]   ;;  %v968_v11 = vld [vmem:[%s1124_s27 + $0x10] sm:$0xff]  }
  0x23   : > { %513 = vmatprep.mubr.bf16.mxu1 %v311_v4  ;;  %904 = vmatprep.subr.bf16.mxu1 %v963_v6  ;;  %v969_v12 = vld [vmem:[%s1124_s27 + $0x58] sm:$0xff]   ;;  %v971_v14 = vld [vmem:[%s1124_s27 + $0x60] sm:$0xff]   ;;  %v973_v16 = vld [vmem:[%s1124_s27 + $0x68] sm:$0xff]  }
  0x24   : > { %841 = vmatpush3.bf16.msra.mxu0 %v964_v7  ;;  %912 = vmatpush3.bf16.msra.mxu1 %v964_v7  ;;  %v970_v13 = vld [vmem:[%s1124_s27 + $0x18] sm:$0xff]   ;;  %v972_v15 = vld [vmem:[%s1124_s27 + $0x20] sm:$0xff]   ;;  %v974_v20 = vld [vmem:[%s1124_s27 + $0x28] sm:$0xff]  }
  0x25   : > { %842 = vmatprep.subr.bf16.mxu0 %v965_v8  ;;  %905 = vmatprep.subr.bf16.mxu1 %v965_v8  ;;  %v563_v21 = vld [vmem:[%s1092_s16 + $0x8] sm:$0xff]  ;;  %v975_v22 = vld [vmem:[%s1124_s27 + $0x70] sm:$0xff]   ;;  %v977_v26 = vld [vmem:[%s1124_s27 + $0x78] sm:$0xff]  }
  0x26   : > { %595 = vperm.xlu1 %962, %v565_v19   ;;  %585 = vperm.xlu0 %961, %v563_v21   ;;  %v567_v23 = vld [vmem:[%s1092_s16 + $0x28] sm:$0xff]  ;;  %v976_v24 = vld [vmem:[%s1124_s27 + $0x30] sm:$0xff]   ;;  %v294_v27 = vld [vmem:[%s1082_s5] sm:$0xff] }
  0x27   : > { %v569_v28 = vld [vmem:[%s1092_s16 + $0x38] sm:$0xff]  ;;  %v298_v30 = vld [vmem:[%s1082_s5 + $0x20] sm:$0xff]  ;;  %v568_v31 = vld [vmem:[%s1092_s16 + $0x30] sm:$0xff]  ;;  %v302_v32 = vunpack.c.l.s8.bf16 %v294_v27  ;;  %v304_v42 = vunpack.c.h.s8.bf16 %v294_v27 }
  0x28   : > { %843 = vmatpush3.bf16.msra.mxu0 %v966_v9  ;;  %913 = vmatpush3.bf16.msra.mxu1 %v966_v9  ;;  %v978_v29 = vld [vmem:[%s1124_s27 + $0x38] sm:$0xff]   ;;  %v310_v33 = vunpack.c.l.s8.bf16 %v298_v30  ;;  %v571_v34 = vld [vmem:[%s1092_s16 + $0x48] sm:$0xff]  ;;  %v570_v37 = vld [vmem:[%s1092_s16 + $0x40] sm:$0xff]  ;;  %v312_v43 = vunpack.c.h.s8.bf16 %v298_v30 }
  0x29   : > { %844 = vmatprep.subr.bf16.mxu0 %v967_v10  ;;  %906 = vmatprep.subr.bf16.mxu1 %v967_v10  ;;  %v573_v38 = vld [vmem:[%s1092_s16 + $0x58] sm:$0xff]  ;;  %v572_v41 = vld [vmem:[%s1092_s16 + $0x50] sm:$0xff]  ;;  %v575_v44 = vld [vmem:[%s1092_s16 + $0x68] sm:$0xff] }
  0x2a   : > { %605 = vperm.xlu1 %962, %v567_v23   ;;  %600 = vperm.xlu0 %961, %v566_v25   ;;  %v297_v39 = vld [vmem:[%s1082_s5 + $0x18] sm:$0xff]  ;;  %v574_v47 = vld [vmem:[%s1092_s16 + $0x60] sm:$0xff]  ;;  %v296_v49 = vld [vmem:[%s1082_s5 + $0x10] sm:$0xff] }
  0x2b   : > { %v301_v40 = vld [vmem:[%s1082_s5 + $0x38] sm:$0xff]  ;;  %v307_v45 = vunpack.c.l.s8.bf16 %v297_v39  ;;  %v300_v50 = vld [vmem:[%s1082_s5 + $0x30] sm:$0xff]  ;;  %v306_v52 = vunpack.c.l.s8.bf16 %v296_v49  ;;  %v309_v54 = vunpack.c.h.s8.bf16 %v297_v39  ;;  %v308_v56 = vunpack.c.h.s8.bf16 %v296_v49  ;;  %v555_v21 = vld [vmem:[%s1087_s12 + $0x48] sm:$0xff] }
  0x2c   : > { %845 = vmatpush3.bf16.msra.mxu0 %v968_v11  ;;  %914 = vmatpush3.bf16.msra.mxu1 %v968_v11  ;;  %v315_v46 = vunpack.c.l.s8.bf16 %v301_v40  ;;  %v577_v48 = vld [vmem:[%s1092_s16 + $0x78] sm:$0xff]  ;;  %v576_v51 = vld [vmem:[%s1092_s16 + $0x70] sm:$0xff]  ;;  %v314_v53 = vunpack.c.l.s8.bf16 %v300_v50  ;;  %v317_v55 = vunpack.c.h.s8.bf16 %v301_v40  ;;  %v316_v57 = vunpack.c.h.s8.bf16 %v300_v50  ;;  %v546_v11 = vld [vmem:[%s1087_s12] sm:$0xff] }
  0x2d   : > { %846 = vmatprep.subr.bf16.mxu0 %v969_v12  ;;  %907 = vmatprep.subr.bf16.mxu1 %v969_v12  ;;  %v554_v12 = vld [vmem:[%s1087_s12 + $0x40] sm:$0xff] }
  0x2e   : > { %615 = vperm.xlu1 %962, %v569_v28   ;;  %610 = vperm.xlu0 %961, %v568_v31  }
  0x30   : > { %847 = vmatpush3.bf16.msra.mxu0 %v970_v13  ;;  %915 = vmatpush3.bf16.msra.mxu1 %v970_v13 }
  0x31   : > { %848 = vmatprep.subr.bf16.mxu0 %v971_v14  ;;  %908 = vmatprep.subr.bf16.mxu1 %v971_v14 }
  0x32   : > { %625 = vperm.xlu1 %962, %v571_v34   ;;  %620 = vperm.xlu0 %961, %v570_v37   ;;  %v548_v37 = vld [vmem:[%s1087_s12 + $0x10] sm:$0xff] }
  0x34   : > { %849 = vmatpush3.bf16.msra.mxu0 %v972_v15  ;;  %916 = vmatpush3.bf16.msra.mxu1 %v972_v15 }
  0x35   : > { %850 = vmatprep.subr.bf16.mxu0 %v973_v16  ;;  %909 = vmatprep.subr.bf16.mxu1 %v973_v16 }
  0x36   : > { %635 = vperm.xlu1 %962, %v573_v38   ;;  %630 = vperm.xlu0 %961, %v572_v41   ;;  %v556_v38 = vld [vmem:[%s1087_s12 + $0x50] sm:$0xff] }
  0x38   : > { %851 = vmatpush3.bf16.msra.mxu0 %v974_v20  ;;  %917 = vmatpush3.bf16.msra.mxu1 %v974_v20  ;;  %v547_v20 = vld [vmem:[%s1087_s12 + $0x8] sm:$0xff] }
  0x39   : > { %852 = vmatprep.subr.bf16.mxu0 %v975_v22  ;;  %910 = vmatprep.subr.bf16.mxu1 %v975_v22 }
  0x3a   : > { %645 = vperm.xlu1 %962, %v575_v44   ;;  %640 = vperm.xlu0 %961, %v574_v47   ;;  %v557_v47 = vld [vmem:[%s1087_s12 + $0x58] sm:$0xff] }
  0x3c   : > { %853 = vmatpush3.bf16.msra.mxu0 %v976_v24  ;;  %918 = vmatpush3.bf16.msra.mxu1 %v976_v24 }
  0x3d   : > { %854 = vmatprep.subr.bf16.mxu0 %v977_v26  ;;  %911 = vmatprep.subr.bf16.mxu1 %v977_v26 }
  0x3e   : > { %655 = vperm.xlu1 %962, %v577_v48   ;;  %650 = vperm.xlu0 %961, %v576_v51  }
  0x40   : > { %855 = vmatpush3.bf16.msra.mxu0 %v978_v29  ;;  %919 = vmatpush3.bf16.msra.mxu1 %v978_v29 }
  0x43   : > { %482 = vmatmul.mubr.bf16.vlgmr.msra.gmra.mrb[0].mxu0 %v302_v32  ;;  %514 = vmatmul.mubr.bf16.vlgmr.msra.gmra.mrb[0].mxu1 %v310_v33 }
  0x44   : > { %489 = vmatprep.mubr.bf16.mxu0 %v305_v35  ;;  %521 = vmatprep.mubr.bf16.mxu1 %v313_v36 }
  0x4b   : > { %490 = vmatmul.mubr.bf16.gmra.mrb[4].mxu0 %v304_v42  ;;  %522 = vmatmul.mubr.bf16.gmra.mrb[4].mxu1 %v312_v43 }
  0x4c   : > { %497 = vmatprep.mubr.bf16.mxu0 %v307_v45  ;;  %529 = vmatprep.mubr.bf16.mxu1 %v315_v46  ;;  %v549_v46 = vld [vmem:[%s1087_s12 + $0x18] sm:$0xff] }
  0x53   : > { %498 = vmatmul.mubr.bf16.gmra.mrb[8].mxu0 %v306_v52  ;;  %530 = vmatmul.mubr.bf16.gmra.mrb[8].mxu1 %v314_v53 }
  0x54   : > { %505 = vmatprep.mubr.bf16.mxu0 %v309_v54  ;;  %537 = vmatprep.mubr.bf16.mxu1 %v317_v55 }
  0x5b   : > { %506 = vmatmul.mubr.bf16.gmra.mrb[12].mxu0 %v308_v56  ;;  %538 = vmatmul.mubr.bf16.gmra.mrb[12].mxu1 %v316_v57 }
  0xa0   : > { %v581_v58 = vpop.permute.xlu0 %580  ;;  %v591_v59 = vpop.permute.xlu1 %590 }
  0xa5   : > { %v586_v60 = vpop.permute.xlu0 %585  ;;  %v596_v61 = vpop.permute.xlu1 %595 }
  0xa9   : > { %v1168_v62 = vpop.permute.xlu0 %600  ;;  %v1170_v63 = vpop.permute.xlu1 %605 }
  0xad   : > { %v1172_v0 = vpop.permute.xlu0 %610  ;;  %v1174_v1 = vpop.permute.xlu1 %615 }
  0xb1   : > { %v621_v2 = vpop.permute.xlu0 %620  ;;  %v626_v19 = vpop.permute.xlu1 %625 }
  0xb5   : > { %v631_v26 = vpop.permute.xlu0 %630  ;;  %v636_v45 = vpop.permute.xlu1 %635 }
  0xb9   : > { %v641_v52 = vpop.permute.xlu0 %640 }
 0x116   : > { %v856_v3 = vpop.f32.mrb[0].mxu0  ;;  %v880_v4 = vpop.f32.mrb[0].mxu1 }
 0x117   : > { %v857_v5 = vpop.f32.mrb[1].mxu0  ;;  %v881_v6 = vpop.f32.mrb[1].mxu1 }
 0x118   : > { %v858_v7 = vadd.f32 %v857_v5, %v856_v3  ;;  %v882_v8 = vadd.f32 %v881_v6, %v880_v4  ;;  %v859_v9 = vpop.f32.mrb[2].mxu0  ;;  %v883_v10 = vpop.f32.mrb[2].mxu1  ;;  %v550_v3 = vld [vmem:[%s1087_s12 + $0x20] sm:$0xff] }
 0x119   : > { %v860_v13 = vpop.f32.mrb[3].mxu0  ;;  %v884_v14 = vpop.f32.mrb[3].mxu1  ;;  %v558_v4 = vld [vmem:[%s1087_s12 + $0x60] sm:$0xff] }
 0x11a   : > { %v658_v15 = vmul.f32 %v858_v7, %v581_v58  ;;  %v666_v16 = vmul.f32 %v882_v8, %v621_v2  ;;  %v861_v17 = vadd.f32 %v860_v13, %v859_v9  ;;  %v885_v18 = vadd.f32 %v884_v14, %v883_v10  ;;  %v559_v13 = vld [vmem:[%s1087_s12 + $0x68] sm:$0xff] }
 0x11c   : > { %v674_v22 = vadd.f32 %v658_v15, %v546_v11  ;;  %v682_v23 = vadd.f32 %v666_v16, %v554_v12  ;;  %v659_v24 = vmul.f32 %v861_v17, %v586_v60  ;;  %v667_v25 = vmul.f32 %v885_v18, %v626_v19  ;;  %v646_v11 = vpop.permute.xlu1 %645  ;;  %v551_v12 = vld [vmem:[%s1087_s12 + $0x28] sm:$0xff]  ;;  %v651_v18 = vpop.permute.xlu0 %650 }
 0x11e   : > { %690 = vst [vmem:[%s1087_s12] sm:$0xff] %v674_v22  ;;  %698 = vst [vmem:[%s1087_s12 + $0x40] sm:$0xff] %v682_v23  ;;  %v675_v27 = vadd.f32 %v659_v24, %v547_v20  ;;  %v683_v28 = vadd.f32 %v667_v25, %v555_v21  ;;  %v862_v29 = vpop.f32.mrb[4].mxu0  ;;  %v886_v30 = vpop.f32.mrb[4].mxu1 }
 0x11f   : > { %v863_v31 = vpop.f32.mrb[5].mxu0  ;;  %v887_v32 = vpop.f32.mrb[5].mxu1 }
 0x120   : > { %691 = vst [vmem:[%s1087_s12 + $0x8] sm:$0xff] %v675_v27  ;;  %699 = vst [vmem:[%s1087_s12 + $0x48] sm:$0xff] %v683_v28  ;;  %v864_v33 = vadd.f32 %v863_v31, %v862_v29  ;;  %v888_v34 = vadd.f32 %v887_v32, %v886_v30  ;;  %v865_v35 = vpop.f32.mrb[6].mxu0  ;;  %v889_v36 = vpop.f32.mrb[6].mxu1  ;;  %v552_v27 = vld [vmem:[%s1087_s12 + $0x30] sm:$0xff] }
 0x121   : > { %v866_v39 = vpop.f32.mrb[7].mxu0  ;;  %v890_v40 = vpop.f32.mrb[7].mxu1  ;;  %v560_v28 = vld [vmem:[%s1087_s12 + $0x70] sm:$0xff] }
 0x122   : > { %v660_v41 = vmul.f32 %v864_v33, %v591_v59  ;;  %v668_v42 = vmul.f32 %v888_v34, %v631_v26  ;;  %v867_v43 = vadd.f32 %v866_v39, %v865_v35  ;;  %v891_v44 = vadd.f32 %v890_v40, %v889_v36  ;;  %v656_v35 = vpop.permute.xlu1 %655  ;;  %v553_v36 = vld [vmem:[%s1087_s12 + $0x38] sm:$0xff] }
 0x124   : > { %v676_v48 = vadd.f32 %v660_v41, %v548_v37  ;;  %v684_v49 = vadd.f32 %v668_v42, %v556_v38  ;;  %v661_v50 = vmul.f32 %v867_v43, %v596_v61  ;;  %v669_v51 = vmul.f32 %v891_v44, %v636_v45  ;;  %v561_v37 = vld [vmem:[%s1087_s12 + $0x78] sm:$0xff] }
 0x126   : > { %692 = vst [vmem:[%s1087_s12 + $0x10] sm:$0xff] %v676_v48  ;;  %700 = vst [vmem:[%s1087_s12 + $0x50] sm:$0xff] %v684_v49  ;;  %v677_v53 = vadd.f32 %v661_v50, %v549_v46  ;;  %v685_v54 = vadd.f32 %v669_v51, %v557_v47  ;;  %v868_v55 = vpop.f32.mrb[8].mxu0  ;;  %v892_v56 = vpop.f32.mrb[8].mxu1 }
 0x127   : > { %v869_v57 = vpop.f32.mrb[9].mxu0  ;;  %v893_v58 = vpop.f32.mrb[9].mxu1 }
 0x128   : > { %693 = vst [vmem:[%s1087_s12 + $0x18] sm:$0xff] %v677_v53  ;;  %701 = vst [vmem:[%s1087_s12 + $0x58] sm:$0xff] %v685_v54  ;;  %v870_v59 = vadd.f32 %v869_v57, %v868_v55  ;;  %v894_v60 = vadd.f32 %v893_v58, %v892_v56  ;;  %v871_v2 = vpop.f32.mrb[10].mxu0  ;;  %v895_v61 = vpop.f32.mrb[10].mxu1 }
 0x129   : > { %v872_v5 = vpop.f32.mrb[11].mxu0  ;;  %v896_v6 = vpop.f32.mrb[11].mxu1 }
 0x12a   : > { %v662_v7 = vmul.f32 %v870_v59, %v1168_v62  ;;  %v670_v8 = vmul.f32 %v894_v60, %v641_v52  ;;  %v873_v9 = vadd.f32 %v872_v5, %v871_v2  ;;  %v897_v10 = vadd.f32 %v896_v6, %v895_v61 }
 0x12c   : > { %v678_v14 = vadd.f32 %v662_v7, %v550_v3  ;;  %v686_v15 = vadd.f32 %v670_v8, %v558_v4  ;;  %v663_v16 = vmul.f32 %v873_v9, %v1170_v63  ;;  %v671_v17 = vmul.f32 %v897_v10, %v646_v11 }
 0x12e   : > { %694 = vst [vmem:[%s1087_s12 + $0x20] sm:$0xff] %v678_v14  ;;  %702 = vst [vmem:[%s1087_s12 + $0x60] sm:$0xff] %v686_v15  ;;  %v679_v19 = vadd.f32 %v663_v16, %v551_v12  ;;  %v687_v62 = vadd.f32 %v671_v17, %v559_v13  ;;  %v874_v20 = vpop.f32.mrb[12].mxu0  ;;  %v898_v21 = vpop.f32.mrb[12].mxu1 }
 0x12f   : > { %v875_v22 = vpop.f32.mrb[13].mxu0  ;;  %v899_v23 = vpop.f32.mrb[13].mxu1 }
 0x130   : > { %695 = vst [vmem:[%s1087_s12 + $0x28] sm:$0xff] %v679_v19  ;;  %703 = vst [vmem:[%s1087_s12 + $0x68] sm:$0xff] %v687_v62  ;;  %v876_v24 = vadd.f32 %v875_v22, %v874_v20  ;;  %v900_v25 = vadd.f32 %v899_v23, %v898_v21  ;;  %v877_v26 = vpop.f32.mrb[14].mxu0  ;;  %v901_v63 = vpop.f32.mrb[14].mxu1 }
 0x131   : > { %v878_v29 = vpop.f32.mrb[15].mxu0  ;;  %v902_v30 = vpop.f32.mrb[15].mxu1 }
 0x132   : > { %v664_v31 = vmul.f32 %v876_v24, %v1172_v0  ;;  %v672_v32 = vmul.f32 %v900_v25, %v651_v18  ;;  %v879_v33 = vadd.f32 %v878_v29, %v877_v26  ;;  %v903_v34 = vadd.f32 %v902_v30, %v901_v63 }
 0x134   : > { %v680_v38 = vadd.f32 %v664_v31, %v552_v27  ;;  %v688_v39 = vadd.f32 %v672_v32, %v560_v28  ;;  %v665_v40 = vmul.f32 %v879_v33, %v1174_v1  ;;  %v673_v41 = vmul.f32 %v903_v34, %v656_v35 }
 0x136   : > { %696 = vst [vmem:[%s1087_s12 + $0x30] sm:$0xff] %v680_v38  ;;  %704 = vst [vmem:[%s1087_s12 + $0x70] sm:$0xff] %v688_v39  ;;  %v681_v42 = vadd.f32 %v665_v40, %v553_v36  ;;  %v689_v43 = vadd.f32 %v673_v41, %v561_v37 }
 0x138   : > { %697 = vst [vmem:[%s1087_s12 + $0x38] sm:$0xff] %v681_v42  ;;  %705 = vst [vmem:[%s1087_s12 + $0x78] sm:$0xff] %v689_v43 }
 0x139 PF: > { %s14_s19 = sadd.s32 1, %s1017_s19   ;;  %s1232_s15 = smov %s1009_s17 }
 0x13a   : > { %p11_p9 = scmp.ge.s32.totalorder %s14_s19, 8   ;;  %s1233_s16 = smov %s1013_s18 }
 0x13b   : > { %s1234_s17 = smov %s1237_s20  ;;  %s1235_s18 = smov %s1241_s21 }
 0x13c   :  { %13 = sbr.rel (!%p11_p9) target bundleno = 3 (0x3), region = 74 }

</bundles_post_ra>
